<compile_context>
chip_gen: v6e
topology: v6e:2x2x1
jax: 0.10.0
libtpu: 0.0.40
codegen_flags: <defaults>
</compile_context>

<pallas_src>
import jax
import jax.numpy as jnp
from jax.experimental import pallas as pl
from jax.experimental.pallas import tpu as pltpu


def mixedop_kernel(mix_ref, x_ref, w_ref, o_ref):
    """Grid = (N, HW_tiles).

    mix_ref: SMEM (N, num_ops)          -- scalar-prefetched architecture weights
    x_ref:   VMEM (1, Cin, thw)         -- channels-first activation tile
    w_ref:   VMEM (num_ops, Cout, Cin)  -- all 1x1 conv kernels, resident
    o_ref:   VMEM (1, Cout, thw)        -- lane-dense (HW on lanes) output tile
    """
    n = pl.program_id(0)
    num_ops = w_ref.shape[0]

    # Fold the per-sample mixing into the small weight tensor (Cout*Cin*num_ops
    # VPU flops instead of HW*Cout per op).
    w_eff = mix_ref[n, 0] * w_ref[0]
    for i in range(1, num_ops):           # static unroll; num_ops is tiny
        w_eff = w_eff + mix_ref[n, i] * w_ref[i]

    # Single MXU matmul: (Cout, Cin) @ (Cin, thw) -> (Cout, thw).
    # No in-kernel transpose, f32 accumulation, lane-dense store.
    o_ref[0] = jnp.dot(
        w_eff, x_ref[0], preferred_element_type=jnp.float32
    ).astype(o_ref.dtype)


def _pick_hw_tile(hw, max_tile=2048):
    """Largest 128-multiple divisor of hw that is <= max_tile (else full hw)."""
    if hw <= max_tile or hw % 128 != 0:
        return hw
    for t in range(max_tile, 127, -128):
        if hw % t == 0:
            return t
    return hw


def mixed_op(x_nchw, conv_weights, mix_weights, *, max_hw_tile=2048):
    """
    x_nchw:       (N, Cin, H, W)        float32
    conv_weights: (num_ops, Cout, Cin)  -- 1x1 conv kernels (squeezed, no bias)
    mix_weights:  (N, num_ops)          -- per-sample architecture weights
    returns:      (N, Cout, H, W)
    """
    N, Cin, H, W = x_nchw.shape
    num_ops, Cout, _ = conv_weights.shape
    HW = H * W
    thw = _pick_hw_tile(HW, max_hw_tile)   # keeps v7x's 64 MiB VMEM happy for big maps
    n_hw = HW // thw

    # NCHW is already channels-first: flattening spatial dims is a free reshape.
    x_flat = x_nchw.reshape(N, Cin, HW)

    out_flat = pl.pallas_call(
        mixedop_kernel,
        out_shape=jax.ShapeDtypeStruct((N, Cout, HW), x_nchw.dtype),
        grid_spec=pltpu.PrefetchScalarGridSpec(
            num_scalar_prefetch=1,          # mix_weights -> SMEM scalars
            grid=(N, n_hw),
            in_specs=[
                pl.BlockSpec((1, Cin, thw), lambda n, t, mix: (n, 0, t)),
                pl.BlockSpec((num_ops, Cout, Cin), lambda n, t, mix: (0, 0, 0)),
            ],
            out_specs=pl.BlockSpec((1, Cout, thw), lambda n, t, mix: (n, 0, t)),
        ),
        compiler_params=pltpu.CompilerParams(
            # Fully parallel grid: shards cleanly across v7x's two TensorCores.
            dimension_semantics=("parallel", "parallel"),
        ),
    )(mix_weights, x_flat, conv_weights)

    # (N, Cout, H*W) -> NCHW: pure reshape, no transpose.
    return out_flat.reshape(N, Cout, H, W)


def mixed_op_reference(x_nchw, conv_weights, mix_weights):
    """Pure-JAX reference matching the PyTorch MixedOp.forward."""
    N, Cin, H, W = x_nchw.shape
    num_ops, Cout, _ = conv_weights.shape
    out = jnp.zeros((N, Cout, H, W), jnp.float32)
    for i in range(num_ops):
        r = jnp.einsum("nchw,oc->nohw", x_nchw, conv_weights[i])  # op_i(x), 1x1 conv
        w = mix_weights[:, i].reshape(-1, 1, 1, 1)                # (-1,1,1,1) broadcast
        out = out + w * r
    return out


if __name__ == "__main__":
    key = jax.random.PRNGKey(0)
    N, Cin, H, W = 2, 4, 16, 16
    Cout, num_ops = 4, 3

    kx, kw, km = jax.random.split(key, 3)
    x = jax.random.normal(kx, (N, Cin, H, W), jnp.float32)
    # Deterministic parameters for the candidate blocks (1x1 convs, no bias).
    conv_w = jax.random.normal(kw, (num_ops, Cout, Cin), jnp.float32) * 0.1
    # Architecture (mixing) weights: softmax over the op axis, per sample.
    mix_w = jax.nn.softmax(jax.random.normal(km, (N, num_ops), jnp.float32), axis=-1)

    out = jax.block_until_ready(mixed_op(x, conv_w, mix_w))
    ref = jax.block_until_ready(mixed_op_reference(x, conv_w, mix_w))

    assert out.shape == (N, Cout, H, W), out.shape
    assert jnp.allclose(out, ref, atol=1e-4, rtol=1e-4), float(jnp.max(jnp.abs(out - ref)))
    print("KERNEL_OK")
</pallas_src>

<mosaic_0001>
module attributes {stable_mosaic.version = 11 : i64} {
  func.func @mixedop_kernel(%arg0: i32, %arg1: i32, %arg2: memref<2x3xf32, #tpu.memory_space<smem>>, %arg3: memref<1x4x256xf32, #tpu.memory_space<vmem>>, %arg4: memref<3x4x4xf32, #tpu.memory_space<vmem>>, %arg5: memref<1x4x256xf32, #tpu.memory_space<vmem>>) attributes {dimension_semantics = [#tpu.dimension_semantics<parallel>, #tpu.dimension_semantics<parallel>], iteration_bounds = array<i64: 2, 1>, scalar_prefetch = 1 : i64, scratch_operands = 0 : i64, tpu.core_type = #tpu.core_type<tc>, window_params = [{transform_indices = @transform_0, window_bounds = array<i64: 1, 4, 256>}, {pipeline_mode = #tpu.pipeline_mode<synchronous>, transform_indices = @transform_1, window_bounds = array<i64: 3, 4, 4>}, {transform_indices = @transform_2, window_bounds = array<i64: 1, 4, 256>}]} {
    %0 = arith.index_cast %arg0 : i32 to index
    %c0 = arith.constant 0 : index
    %1 = memref.load %arg2[%0, %c0] : memref<2x3xf32, #tpu.memory_space<smem>>
    %c0_0 = arith.constant 0 : index
    %c0_1 = arith.constant 0 : index
    %c0_2 = arith.constant 0 : index
    %2 = vector.load %arg4[%c0_0, %c0_1, %c0_2] : memref<3x4x4xf32, #tpu.memory_space<vmem>>, vector<1x4x4xf32>
    %3 = vector.shape_cast %2 : vector<1x4x4xf32> to vector<4x4xf32>
    %4 = vector.broadcast %1 : f32 to vector<4x4xf32>
    %5 = arith.mulf %4, %3 : vector<4x4xf32>
    %6 = arith.index_cast %arg0 : i32 to index
    %c1 = arith.constant 1 : index
    %7 = memref.load %arg2[%6, %c1] : memref<2x3xf32, #tpu.memory_space<smem>>
    %c1_3 = arith.constant 1 : index
    %c0_4 = arith.constant 0 : index
    %c0_5 = arith.constant 0 : index
    %8 = vector.load %arg4[%c1_3, %c0_4, %c0_5] : memref<3x4x4xf32, #tpu.memory_space<vmem>>, vector<1x4x4xf32>
    %9 = vector.shape_cast %8 : vector<1x4x4xf32> to vector<4x4xf32>
    %10 = vector.broadcast %7 : f32 to vector<4x4xf32>
    %11 = arith.mulf %10, %9 : vector<4x4xf32>
    %12 = arith.addf %5, %11 : vector<4x4xf32>
    %13 = arith.index_cast %arg0 : i32 to index
    %c2 = arith.constant 2 : index
    %14 = memref.load %arg2[%13, %c2] : memref<2x3xf32, #tpu.memory_space<smem>>
    %c2_6 = arith.constant 2 : index
    %c0_7 = arith.constant 0 : index
    %c0_8 = arith.constant 0 : index
    %15 = vector.load %arg4[%c2_6, %c0_7, %c0_8] : memref<3x4x4xf32, #tpu.memory_space<vmem>>, vector<1x4x4xf32>
    %16 = vector.shape_cast %15 : vector<1x4x4xf32> to vector<4x4xf32>
    %17 = vector.broadcast %14 : f32 to vector<4x4xf32>
    %18 = arith.mulf %17, %16 : vector<4x4xf32>
    %19 = arith.addf %12, %18 : vector<4x4xf32>
    %c0_9 = arith.constant 0 : index
    %c0_10 = arith.constant 0 : index
    %c0_11 = arith.constant 0 : index
    %20 = vector.load %arg3[%c0_9, %c0_10, %c0_11] : memref<1x4x256xf32, #tpu.memory_space<vmem>>, vector<1x4x256xf32>
    %21 = vector.shape_cast %20 : vector<1x4x256xf32> to vector<4x256xf32>
    %cst = arith.constant dense<0.000000e+00> : vector<4x256xf32>
    %22 = tpu.matmul %19, %21, %cst {dimension_numbers = #tpu.dot_dimension_numbers<[1], [0], [0], [1], [0, 0, 1, 1], [], []>} : vector<4x4xf32>, vector<4x256xf32>, vector<4x256xf32> -> vector<4x256xf32>
    %c0_12 = arith.constant 0 : index
    %c0_13 = arith.constant 0 : index
    %c0_14 = arith.constant 0 : index
    %23 = vector.load %arg5[%c0_12, %c0_13, %c0_14] : memref<1x4x256xf32, #tpu.memory_space<vmem>>, vector<1x4x256xf32>
    %24 = vector.shape_cast %23 : vector<1x4x256xf32> to vector<4x256xf32>
    %25 = vector.shape_cast %22 : vector<4x256xf32> to vector<1x4x256xf32>
    tpu.vector_store %arg5[%c0_12, %c0_13, %c0_14], %25 {strides = array<i32>} : memref<1x4x256xf32, #tpu.memory_space<vmem>>, vector<1x4x256xf32>,
    return
  }
  func.func @transform_0(%arg0: i32, %arg1: i32, %arg2: memref<2x3xf32, #tpu.memory_space<smem>>) -> (i32, i32, i32) {
    %c0_i32 = arith.constant 0 : i32
    %c0_i32_0 = arith.constant 0 : i32
    return %arg0, %c0_i32, %arg1 : i32, i32, i32
  }
  func.func @transform_1(%arg0: i32, %arg1: i32, %arg2: memref<2x3xf32, #tpu.memory_space<smem>>) -> (i32, i32, i32) {
    %c0_i32 = arith.constant 0 : i32
    %c0_i32_0 = arith.constant 0 : i32
    %c0_i32_1 = arith.constant 0 : i32
    %c0_i32_2 = arith.constant 0 : i32
    return %c0_i32, %c0_i32_0, %c0_i32_1 : i32, i32, i32
  }
  func.func @transform_2(%arg0: i32, %arg1: i32, %arg2: memref<2x3xf32, #tpu.memory_space<smem>>) -> (i32, i32, i32) {
    %c0_i32 = arith.constant 0 : i32
    %c0_i32_0 = arith.constant 0 : i32
    return %arg0, %c0_i32, %arg1 : i32, i32, i32
  }
}

</mosaic_0001>

<bundles_post_ra>
// kernel: tpu_custom_call.1
= control target key start
LH: loop header
LB: loop body
LE: loop exit
PB: predicated region body
PF: predicated region fallthrough
CT: control target
= control target key end

     0   :  { %s669_s12 = smov [#allocation3]   ;;  %s876_s0 = inlined_call_operand.hbm [shape: f32[2,3], index: 0, kind: input, shape index: {}]   ;;  %s877_s1 = inlined_call_operand.hbm [shape: f32[2,4,256], index: 1, kind: input, shape index: {}]   ;;  %s878_s2 = inlined_call_operand.hbm [shape: f32[3,4,4], index: 2, kind: input, shape index: {}]   ;;  %s879_s3 = inlined_call_operand.hbm [shape: f32[2,4,256], index: 3, kind: output, shape index: {}]  }
   0x1   :  { %9 = dma.hbm_to_smem %s876_s0, 32, %s669_s12, [#allocation2] }
   0x2   :  { %631 = dma.done.wait [#allocation2], 32 }
   0x3   :  { %632 = vsyncadd [#allocation2], 4294967264 }
   0x4   :  { %11 = sfence }
   0x5   :  { %12 = vsyncpa [#allocation5], 0 }
   0x6   :  { %14 = vsyncpa [#allocation5 + $0x1], 0 }
   0x7   :  { %15 = vsyncpa [#allocation8], 0 }
   0x8   :  { %16 = vsyncpa [#allocation6], 0 }
   0x9   :  { %18 = vsyncpa [#allocation6 + $0x1], 0  ;;  %s699_s15 = smov 0   ;;  %s701_s16 = smov 0  }
   0xa   :  { %s703_s17 = smov 0   ;;  %s705_s18 = smov 0  }
   0xb   :  { %s707_s19 = smov 0   ;;  %s709_s20 = smov 0  }
   0xc LB: > { %s418_s0 = sadd.s32 4294967295, %s667_s20   ;;  %s419_s21 = sadd.s32 4294967294, %s667_s20   ;;  %s667_s20 = sphi %s709_s20, %s24_s20   ;;  %s663_s19 = sphi %s707_s19, %s897_s19   ;;  %s659_s18 = sphi %s705_s18, %s896_s18   ;;  %s655_s17 = sphi %s703_s17, %s895_s17   ;;  %s651_s16 = sphi %s701_s16, %s894_s16   ;;  %s647_s15 = sphi %s699_s15, %s893_s15  }
   0xd   : > { %p58_p0 = scmp.ne.s32.totalorder %s651_s16, %s647_s15  ;;  %p733_p1 = scmp.eq.s32.totalorder %s418_s0, 0 }
   0xe   : > { %p737_p2 = scmp.eq.s32.totalorder %s418_s0, 1  ;;  %p111_p3 = scmp.eq.s32.totalorder %s419_s21, 1 }
   0xf   : > { %p743_p4 = por %p733_p1, %p58_p0  ;;  %p420_p5 = scmp.ge.s32.totalorder %s667_s20, 1 }
  0x10   : > { %p748_p6 = por %p111_p3, %p58_p0  ;;  %p118_p7 = scmp.lt.s32.totalorder %s667_s20, 3 }
  0x11   : > { %s883_s24 = scalar_select %p743_p4, 1, 0 }
  0x12   : > { %s884_s25 = scalar_select %p748_p6, 1, 0 }
  0x13   : > { %p753_p8 = pnand %p420_p5, %p118_p7  ;;  %s670_s27 = smov [#allocation7]  }
  0x14   : > { %s130_s28 = sshll.u32 %s670_s27, 4  ;;  %s36_s30 = sadd.s32 1, %s663_s19  ;;  %s131_s28 = int_to_ptr.vmem [resolvable:$true] %s130_s28 }
  0x15   : > { %p449_p9 = pneg %p753_p8  ;;  %s538_s4 = scalar_lea.vmem %s131_s28, 192 }
  0x16   : > { %p539_p13 = scmp.ne.s32.totalorder %s131_s28, %s538_s4  ;;  %p546_p5 = scmp.lt.s32.totalorder %s131_s28, %s131_s28 }
  0x17   : > { %p762_p11 = pnand %p449_p9, %p733_p1  ;;  %p547_p7 = scmp.lt.s32.totalorder %s538_s4, %s538_s4 }
  0x19   : > { %p529_p12 = pneg %p762_p11  ;;  %p548_p6 = por %p547_p7, %p546_p5 }
  0x1b   : > { %p541_p0 = pnand %p539_p13, %p529_p12 }
  0x1d   : > { %p542_p3 = pneg %p541_p0 }
  0x1f   : > { %p549_p4 = pnand %p548_p6, %p542_p3 }
  0x21   : > { %552 = shalt.err (!%p549_p4)
}
  0x22   : > { %s671_s5 = smov 64   ;;  %s672_s6 = smov 4  }
  0x23   : > { %452 = dma.hbm_to_vmem [thread:$0]  (!%p762_p11), %s878_s2, 192, %s131_s28, [#allocation8], %s671_s5, %s671_s5, %s672_s6  }
  0x24   : > { %p38_p6 = scmp.ge.s32.totalorder %s36_s30, 2  ;;  %s45_s9 = sadd.s32 1, %s655_s17 }
  0x25   : > { %p52_p4 = scmp.ne.s32.totalorder %s655_s17, %s651_s16  ;;  %p53_p9 = scmp.eq.s32.totalorder %s667_s20, 0 }
  0x26   : > { %s899_s30 = smov (%p38_p6, %s36_s30), 0  ;;  %p462_p0 = scmp.lt.s32.totalorder %s667_s20, 2 }
  0x27   : > { %p780_p12 = por %p53_p9, %p52_p4  ;;  %p786_p13 = por %p737_p2, %p52_p4 }
  0x28   : > { %s40_s12 = ssub.s32 %s663_s19, %s899_s30  ;;  %s144_s13 = sand.u32 1, %s655_s17  }
  0x29   : > { %p43_p11 = scmp.eq.s32.totalorder %s40_s12, 0  ;;  %s423_s14 = sshll.u32 %s144_s13, 3 }
  0x2a   : > { %s439_s21 = sshll.u32 %s663_s19, 7  ;;  %s148_s4 = scalar_lea.vmem [#allocation4], %s423_s14 }
  0x2b   : > { %s795_s0 = scalar_select %p43_p11, %s655_s17, %s45_s9  }
  0x2c   : > { %s156_s29 = scalar_lea.hbm %s877_s1, %s439_s21  ;;  %s158_s5 = sshll.u32 %s148_s4, 4  ;;  %s159_s5 = int_to_ptr.vmem [resolvable:$true] %s158_s5 }
  0x2d   : > { %p803_p2 = pnand %p462_p0, %p780_p12  ;;  %s145_s6 = scalar_lea.sflag [#allocation5], %s144_s13 }
  0x2e   : > { %s566_s7 = scalar_lea.vmem %s159_s5, 128  ;;  %s673_s8 = smov [#allocation4]  }
  0x2f   : > { %p555_p3 = pneg %p803_p2  ;;  %p567_p5 = scmp.ne.s32.totalorder %s159_s5, %s566_s7 }
  0x30   : > { %s571_s9 = sshll.u32 %s673_s8, 4  ;;  %s572_s9 = int_to_ptr.vmem [resolvable:$false] %s571_s9 }
  0x31   : > { %p569_p7 = pnand %p567_p5, %p555_p3  ;;  %s573_s12 = scalar_lea.vmem %s572_s9, 256 }
  0x32   : > { %p574_p4 = scmp.lt.s32.totalorder %s159_s5, %s572_s9  ;;  %p575_p9 = scmp.lt.s32.totalorder %s573_s12, %s566_s7 }
  0x33   : > { %p570_p6 = pneg %p569_p7 }
  0x34   : > { %p576_p11 = por %p575_p9, %p574_p4 }
  0x36   : > { %p577_p10 = pnand %p576_p11, %p570_p6 }
  0x38   : > { %580 = shalt.err (!%p577_p10)
}
  0x39   : > { %456 = dma.hbm_to_vmem [thread:$0]  (!%p803_p2), %s156_s29, 128, %s159_s5, %s145_s6  }
  0x3a   : > { %167 = sbr.rel (%p753_p8) target bundleno = 291 (0x123), region = 28  ;;  %s814_s10 = sand.u32 (!%p753_p8), 1, %s651_s16  }
  0x3b   : > { %s427_s13 = sshll.u32 (!%p753_p8), %s814_s10, 3  ;;  %s170_s14 = scalar_lea.sflag (!%p753_p8), [#allocation5], %s814_s10 }
  0x3c   : > { %s173_s21 = scalar_lea.vmem (!%p753_p8), [#allocation4], %s427_s13  ;;  %p890_p12 = scmp.ne.s32.totalorder (!%p753_p8), %s883_s24, 0 }
  0x3f   : > { %634 = dma.done.wait (%p890_p12), %s170_s14, 128  }
  0x40   : > { %636 = vsyncadd (%p890_p12), %s170_s14, 4294967168 }
  0x41   : > { %638 = dma.done.wait (%p733_p1), [#allocation8], 192  }
  0x42   : > { %640 = vsyncadd (%p733_p1), [#allocation8], 4294967104  ;;  %s829_s26 = sshll.u32 %s659_s18, 7  ;;  %v674_v0 = vmov 0.0   ;;  %v219_v1 = vld [vmem:[%s173_s21] sm:$0xff]  ;;  %vm226_vm0 = vcmask 1043456  }
  0x43   : > { %295 = vmatprep.mubr.f32.mxu0 %v674_v0  ;;  %s201_s27 = sld [smem:[#allocation3 + %s829_s26]]  ;;  %s205_s28 = sadd.s32 1, %s829_s26  ;;  %v202_v2 = vld [vmem:[#allocation7] sm:$0xf]  ;;  %v208_v4 = vld [vmem:[#allocation7 + $0x4] sm:$0xf]  ;;  %v221_v5 = vcombine.high %v219_v1, %v219_v1 }
  0x44   : > { %s206_s29 = sld [smem:[#allocation3 + %s205_s28]]  ;;  %s212_s4 = sadd.s32 2, %s829_s26  ;;  %v215_v8 = vld [vmem:[#allocation7 + $0x8] sm:$0xf]  ;;  %vm222_vm1 = vcmask 31744  }
  0x45   : > { %s213_s24 = sld [smem:[#allocation3 + %s212_s4]]  ;;  %431 = vmatprep.subr.msk.mxu0 %vm226_vm0, %v221_v5  ;;  %s197_s18 = scalar_lea.vmem [#allocation9], %s427_s13 }
  0x46   : > { %432 = vmatpush1.msk.msra.mxu0 %vm226_vm0, %v219_v1  ;;  %s324_s22 = sshll.u32 %s197_s18, 4  ;;  %s322_s6 = scalar_lea.hbm %s879_s3, %s829_s26  ;;  %s325_s22 = int_to_ptr.vmem [resolvable:$true] %s324_s22 }
  0x47   : > { %s308_s7 = scalar_lea.sflag [#allocation6], %s814_s10  ;;  %s581_s8 = scalar_lea.vmem %s325_s22, 128 }
  0x48   : > { %p582_p1 = scmp.ne.s32.totalorder %s325_s22, %s581_s8  ;;  %s675_s9 = smov [#allocation9]  }
  0x49   : > { %v203_v3 = vstv %s201_s27  ;;  %s585_s12 = sshll.u32 %s675_s9, 4  ;;  %s586_s12 = int_to_ptr.vmem [resolvable:$false] %s585_s12 }
  0x4a   : > { %v204_v6 = vmul.f32 %v203_v3, %v202_v2  ;;  %v209_v7 = vstv %s206_s29  ;;  %p583_p8 = pnand %p582_p1, %p786_p13  ;;  %s587_s14 = scalar_lea.vmem %s586_s12, 256 }
  0x4b   : > { %v210_v9 = vmul.f32 %v209_v7, %v208_v4  ;;  %v216_v10 = vstv %s213_s24  ;;  %p588_p0 = scmp.lt.s32.totalorder %s325_s22, %s586_s12  ;;  %p589_p2 = scmp.lt.s32.totalorder %s587_s14, %s581_s8 }
  0x4c   : > { %v217_v11 = vmul.f32 %v216_v10, %v215_v8  ;;  %p584_p10 = pneg %p583_p8 }
  0x4d   : > { %v211_v12 = vadd.f32 %v210_v9, %v204_v6  ;;  %p590_p3 = por %p589_p2, %p588_p0 }
  0x4f   : > { %v218_v13 = vadd.f32 %v217_v11, %v211_v12  ;;  %p591_p5 = pnand %p590_p3, %p584_p10 }
  0x51   : > { %433 = vmatmul.mubr.msk.f32.vlgmr.msra.gmra.mxu0 %vm222_vm1, %v218_v13 }
 0x111   : > { %v297_v14 = vpop.f32.mrf.mxu0 }
 0x113   : > { %v299_v15 = vpop.f32.mrf.mxu0 }
 0x114   : > { %v304_v16 = vcombine.low %v297_v14, %v299_v15 }
 0x116   : > { %306 = vst [vmem:[%s197_s18] sm:$0xff] %v304_v16 }
 0x117   : > { %594 = shalt.err (!%p591_p5)
}
 0x118   : > { %s595_s13 = scalar_lea.hbm %s322_s6, 128  ;;  %s599_s26 = scalar_lea.hbm %s879_s3, 256 }
 0x119   : > { %p596_p7 = scmp.ne.s32.totalorder %s322_s6, %s595_s13  ;;  %p600_p9 = scmp.lt.s32.totalorder %s322_s6, %s879_s3 }
 0x11a   : > { %p601_p11 = scmp.lt.s32.totalorder %s599_s26, %s595_s13 }
 0x11b   : > { %p597_p6 = pnand %p596_p7, %p786_p13 }
 0x11c   : > { %p602_p12 = por %p601_p11, %p600_p9 }
 0x11d   : > { %p598_p4 = pneg %p597_p6 }
 0x11f   : > { %p603_p1 = pnand %p602_p12, %p598_p4 }
 0x121   : > { %606 = shalt.err (!%p603_p1)
}
 0x122   : > { %447 = dma.vmem_to_hbm [thread:$0]  (%p786_p13), %s325_s22, 128, %s322_s6, %s308_s7  }
 0x123 PF: > { %s336_s29 = sand.u32 1, %s647_s15   ;;  %p891_p8 = scmp.ne.s32.totalorder %s884_s25, 0 }
 0x124   : > { %p892_p10 = scmp.ge.s32.totalorder %s667_s20, 2  ;;  %s337_s4 = scalar_lea.sflag [#allocation6], %s336_s29 }
 0x126   : > { %p458_p0 = pnand %p892_p10, %p891_p8 }
 0x128   : > { %p459_p2 = pneg %p458_p0 }
 0x12a   : > { %642 = dma.done.wait (%p459_p2), %s337_s4, 128  }
 0x12b   : > { %644 = vsyncadd (%p459_p2), %s337_s4, 4294967168  ;;  %s24_s20 = sadd.s32 1, %s667_s20   ;;  %s893_s15 = smov %s651_s16 }
 0x12c   : > { %p21_p3 = scmp.ge.s32.totalorder %s24_s20, 4   ;;  %s894_s16 = smov %s655_s17 }
 0x12d   : > { %s895_s17 = smov %s795_s0  ;;  %s896_s18 = smov %s663_s19 }
 0x12e   : > { %s897_s19 = smov %s899_s30  ;;  %23 = sbr.rel (!%p21_p3) target bundleno = 12 (0xc), region = 79 }
 0x133   :  { %342 = vsyncpa [#allocation5], 1 }
 0x134   :  { %344 = vsyncpa [#allocation5 + $0x1], 1 }
 0x135   :  { %345 = vsyncpa [#allocation8], 1 }
 0x136   :  { %346 = vsyncpa [#allocation6], 1 }
 0x137   :  { %348 = vsyncpa [#allocation6 + $0x1], 1 }

</bundles_post_ra>
